<compile_context>
chip_gen: v7x
topology: tpu7x:2x2x1
jax: 0.10.0
libtpu: 0.0.40
codegen_flags: <defaults>
</compile_context>

<pallas_src>
import jax
import jax.numpy as jnp
from jax.experimental import pallas as pl
from jax.experimental.pallas import tpu as pltpu


# ---------------------------------------------------------------------------
# Generation-aware VMEM budgeting / row-tile selection.
# ---------------------------------------------------------------------------
def _vmem_params():
    """Returns (tile_budget_bytes, vmem_limit_bytes, row_tile_cap)."""
    cap = 64 << 20
    try:
        cap = pltpu.get_tpu_info().vmem_capacity_bytes
    except Exception:
        pass  # conservative (v7x-sized) fallback
    if cap >= (100 << 20):               # v5e / v6e: 128 MiB physical VMEM
        return 48 << 20, 64 << 20, 4096
    return 20 << 20, 32 << 20, 2048      # v7x: 64 MiB physical VMEM


def _pick_row_tile(n, d, itemsize, budget, tn_cap):
    """Largest multiple-of-8 row tile fitting the mutate-pass VMEM budget."""
    per_row = 14 * d * itemsize  # double-buffered (3 inputs + 3 stacked + 1 emb)
    tn = min(tn_cap, budget // per_row)
    tn = max(8, (tn // 8) * 8)
    n8 = ((n + 7) // 8) * 8
    return min(tn, n8)


# ---------------------------------------------------------------------------
# Pass A: per-tile min/max partials (vreg-shaped, tail rows masked).
# ---------------------------------------------------------------------------
def _reduce_kernel(nrows_ref, x1_ref, x2_ref, x3_ref, part_ref):
    i = pl.program_id(0)
    tn, d = x1_ref.shape
    r = tn // 8

    row = jax.lax.broadcasted_iota(jnp.int32, (tn, d), 0) + i * tn
    valid = row < nrows_ref[0]

    x1 = x1_ref[...].astype(jnp.float32)
    a2 = jnp.abs(x2_ref[...].astype(jnp.float32))
    a3 = jnp.abs(x3_ref[...].astype(jnp.float32))

    # Fold (tn, D) -> (8, D) with pure VPU min/max; cross-lane reduce to
    # scalars happens once in XLA on the tiny partials array.
    def fold_min(v):
        return jnp.min(jnp.where(valid, v, jnp.inf).reshape(r, 8, d), axis=0)

    def fold_max(v):
        return jnp.max(jnp.where(valid, v, -jnp.inf).reshape(r, 8, d), axis=0)

    part_ref[0] = fold_min(x1)
    part_ref[1] = fold_max(x1)
    part_ref[2] = fold_min(a2)
    part_ref[3] = fold_max(a2)
    part_ref[4] = fold_min(a3)
    part_ref[5] = fold_max(a3)


# ---------------------------------------------------------------------------
# Pass B: elementwise mutations + stack + combination (fully parallel).
# ---------------------------------------------------------------------------
def _mutate_kernel(s_ref, x1_ref, x2_ref, x3_ref, stack_ref, emb_ref):
    x1 = x1_ref[...].astype(jnp.float32)
    a2 = jnp.abs(x2_ref[...].astype(jnp.float32))
    a3 = jnp.abs(x3_ref[...].astype(jnp.float32))

    # minimax_mutation: x*(1 - JSD) + (min + max)*JSD
    m1 = x1 * s_ref[0] + s_ref[1]
    # heuristic_mutation: 0.4*x^2 + 0.3*sin(x) + (0.3*scale)*x     (x = |x|)
    m2 = 0.4 * (a2 * a2) + 0.3 * jnp.sin(a2) + s_ref[2] * a2
    # least_squares_mutation: 0.4*sqrt(x) + 0.3*x^0.8 + (0.3*scale)*(x - 1)
    m3 = 0.4 * jnp.sqrt(a3) + 0.3 * (a3 ** 0.8) + s_ref[3] * (a3 - 1.0)

    # torch.stack([m1, m2, m3], dim=-1), stored stack-axis-first (lane dense).
    stack_ref[0] = m1.astype(stack_ref.dtype)
    stack_ref[1] = m2.astype(stack_ref.dtype)
    stack_ref[2] = m3.astype(stack_ref.dtype)

    # TODO(synk): self.generator_model is undefined in the reference; use a
    # uniform-weight combination of the three mutated matrices as surrogate.
    emb_ref[...] = ((m1 + m2 + m3) * (1.0 / 3.0)).astype(emb_ref.dtype)


# ---------------------------------------------------------------------------
# Surrogate Jensen-Shannon divergence (plain JAX, subsampled).
# ---------------------------------------------------------------------------
def _normalized_hist(v, lo, hi, nbins=128):
    scaled = (v - lo) / (hi - lo + 1e-12) * nbins
    idx = jnp.clip(scaled.astype(jnp.int32), 0, nbins - 1)
    counts = jnp.zeros((nbins,), jnp.float32).at[idx].add(1.0)
    return counts / jnp.sum(counts) + 1e-8


def _js_divergence_surrogate(x, nu_d, theta_g, x_min, x_max,
                             eps=1e-8, nbins=128, max_samples=4096):
    # TODO(synk): reference builds p_data / G via torch.unique counts, sklearn
    # KernelDensity and an undefined self.generator_model; here both
    # distributions are fixed-bin histograms, with x strided-subsampled and the
    # bin range reusing the kernel-computed min/max of x (no extra HBM pass).
    gen = (nu_d @ theta_g).ravel().astype(jnp.float32)
    flat = x.ravel().astype(jnp.float32)
    step = max(1, flat.shape[0] // max_samples)
    xs = flat[::step]
    lo = jnp.minimum(x_min, jnp.min(gen))
    hi = jnp.maximum(x_max, jnp.max(gen))
    p = _normalized_hist(xs, lo, hi, nbins)
    q = _normalized_hist(gen, lo, hi, nbins)
    m = 0.5 * (p + q)
    kl_p = jnp.sum(m * (jnp.log(m) - jnp.log(p))) / nbins  # F.kl_div batchmean
    kl_q = jnp.sum(m * (jnp.log(m) - jnp.log(q))) / nbins
    return 0.5 * (kl_p + kl_q + eps)


# ---------------------------------------------------------------------------
# Forward wrapper.
# ---------------------------------------------------------------------------
def generator_forward(params, nu_d, theta_g):
    x1 = params["embedding_matrix_minimax"]
    x2 = params["embedding_matrix_heuristic"]
    x3 = params["embedding_matrix_least_squares"]
    n, d = x1.shape
    out_dtype = x1.dtype
    itemsize = jnp.dtype(out_dtype).itemsize

    budget, vmem_limit, tn_cap = _vmem_params()
    tn = _pick_row_tile(n, d, itemsize, budget, tn_cap)
    num_tiles = pl.cdiv(n, tn)

    nrows = jnp.full((1,), n, jnp.int32)

    # --- Pass A: min/max partials (row axis fully parallel). ---------------
    partials = pl.pallas_call(
        _reduce_kernel,
        out_shape=jax.ShapeDtypeStruct((num_tiles, 6, 8, d), jnp.float32),
        grid_spec=pltpu.PrefetchScalarGridSpec(
            num_scalar_prefetch=1,
            grid=(num_tiles,),
            in_specs=[pl.BlockSpec((tn, d), lambda i, nr: (i, 0))] * 3,
            out_specs=pl.BlockSpec((None, 6, 8, d), lambda i, nr: (i, 0, 0, 0)),
        ),
        compiler_params=pltpu.CompilerParams(
            dimension_semantics=("parallel",),
            vmem_limit_bytes=vmem_limit,
        ),
    )(nrows, x1, x2, x3)

    min1 = jnp.min(partials[:, 0])
    max1 = jnp.max(partials[:, 1])
    min2 = jnp.min(partials[:, 2])
    max2 = jnp.max(partials[:, 3])
    min3 = jnp.min(partials[:, 4])
    max3 = jnp.max(partials[:, 5])

    jsd = _js_divergence_surrogate(x1, nu_d, theta_g, min1, max1)

    eps = 1e-8
    scalars = jnp.stack([
        1.0 - jsd,
        (min1 + max1) * jsd,
        0.3 * (max2 - min2) / (min2 + max2 + eps),
        0.3 * (max3 - min3) / (min3 + max3 + eps),
    ]).astype(jnp.float32)

    # --- Pass B: mutations + stack + combination (row axis parallel). ------
    stacked, emb = pl.pallas_call(
        _mutate_kernel,
        out_shape=(
            jax.ShapeDtypeStruct((3, n, d), out_dtype),
            jax.ShapeDtypeStruct((n, d), out_dtype),
        ),
        grid_spec=pltpu.PrefetchScalarGridSpec(
            num_scalar_prefetch=1,
            grid=(num_tiles,),
            in_specs=[pl.BlockSpec((tn, d), lambda i, s: (i, 0))] * 3,
            out_specs=(
                pl.BlockSpec((3, tn, d), lambda i, s: (0, i, 0)),
                pl.BlockSpec((tn, d), lambda i, s: (i, 0)),
            ),
        ),
        compiler_params=pltpu.CompilerParams(
            dimension_semantics=("parallel",),
            vmem_limit_bytes=vmem_limit,
        ),
    )(scalars, x1, x2, x3)

    return emb, stacked


if __name__ == "__main__":
    key = jax.random.PRNGKey(0)
    k1, k2, k3 = jax.random.split(key, 3)

    N, D = 24, 128                       # n_node, embedding dim
    node_emd_init = jax.random.normal(k1, (N, D), jnp.float32) * 0.1

    # All embedding matrices initialized from node_emd_init (as in the torch
    # module); biases are zeros (unused in forward).
    params = {
        "embedding_matrix_minimax": node_emd_init,
        "embedding_matrix_heuristic": node_emd_init,
        "embedding_matrix_least_squares": node_emd_init,
        "embedding_matrix": node_emd_init,
        "bias_minimax": jnp.zeros((N,), jnp.float32),
        "bias_heuristic": jnp.zeros((N,), jnp.float32),
        "bias_least_squares": jnp.zeros((N,), jnp.float32),
        "bias": jnp.zeros((N,), jnp.float32),
    }

    nu_d = jax.random.normal(k2, (8, 32), jnp.float32)
    theta_g = jax.random.normal(k3, (32, 16), jnp.float32)

    fwd = jax.jit(generator_forward)
    emb, stacked = fwd(params, nu_d, theta_g)
    jax.block_until_ready((emb, stacked))
    assert emb.shape == (N, D) and stacked.shape == (3, N, D)
    assert bool(jnp.all(jnp.isfinite(emb))) and bool(jnp.all(jnp.isfinite(stacked)))

    # Plain-JAX reference check (same JSD surrogate).
    x1 = params["embedding_matrix_minimax"]
    x2a = jnp.abs(params["embedding_matrix_heuristic"])
    x3a = jnp.abs(params["embedding_matrix_least_squares"])
    jsd_ref = _js_divergence_surrogate(x1, nu_d, theta_g, jnp.min(x1), jnp.max(x1))
    m1_ref = x1 * (1.0 - jsd_ref) + (jnp.min(x1) + jnp.max(x1)) * jsd_ref
    sf2 = (jnp.max(x2a) - jnp.min(x2a)) / (jnp.min(x2a) + jnp.max(x2a) + 1e-8)
    m2_ref = 0.4 * (x2a * x2a) + 0.3 * jnp.sin(x2a) + (0.3 * sf2) * x2a
    sf3 = (jnp.max(x3a) - jnp.min(x3a)) / (jnp.min(x3a) + jnp.max(x3a) + 1e-8)
    m3_ref = 0.4 * jnp.sqrt(x3a) + 0.3 * (x3a ** 0.8) + (0.3 * sf3) * (x3a - 1.0)
    stacked_ref = jnp.stack([m1_ref, m2_ref, m3_ref], axis=0)
    emb_ref = (m1_ref + m2_ref + m3_ref) / 3.0
    assert bool(jnp.allclose(stacked, stacked_ref, atol=1e-4, rtol=1e-4))
    assert bool(jnp.allclose(emb, emb_ref, atol=1e-4, rtol=1e-4))

    print("KERNEL_OK")
</pallas_src>

<mosaic_0001>
module attributes {stable_mosaic.version = 11 : i64} {
  func.func private @main(%arg0: i32) attributes {dimension_semantics = [#tpu.dimension_semantics<core_parallel>], iteration_bounds = array<i64: 2>, tpu.core_type = #tpu.core_type<sc_scalar_subcore>, window_params = []} {
    return
  }
}

module attributes {stable_mosaic.version = 11 : i64} {
  func.func private @main(%arg0: i32) attributes {dimension_semantics = [#tpu.dimension_semantics<core_parallel>], iteration_bounds = array<i64: 2>, tpu.core_type = #tpu.core_type<sc_scalar_subcore>, window_params = []} {
    return
  }
}

module attributes {stable_mosaic.version = 11 : i64} {
  func.func @_reduce_kernel(%arg0: i32, %arg1: memref<1xi32, #tpu.memory_space<smem>>, %arg2: memref<24x128xf32, #tpu.memory_space<vmem>>, %arg3: memref<24x128xf32, #tpu.memory_space<vmem>>, %arg4: memref<24x128xf32, #tpu.memory_space<vmem>>, %arg5: memref<1x6x8x128xf32, #tpu.memory_space<vmem>>) attributes {dimension_semantics = [#tpu.dimension_semantics<parallel>], iteration_bounds = array<i64: 1>, scalar_prefetch = 1 : i64, scratch_operands = 0 : i64, tpu.core_type = #tpu.core_type<tc>, window_params = [{transform_indices = @transform_0, window_bounds = array<i64: 24, 128>}, {transform_indices = @transform_1, window_bounds = array<i64: 24, 128>}, {transform_indices = @transform_2, window_bounds = array<i64: 24, 128>}, {transform_indices = @transform_3, window_bounds = array<i64: 1, 6, 8, 128>}]} {
    %0 = tpu.iota {dimensions = array<i32: 0>} : vector<24x128xi32>
    %c24_i32 = arith.constant 24 : i32
    %1 = arith.muli %arg0, %c24_i32 : i32
    %2 = vector.broadcast %1 : i32 to vector<24x128xi32>
    %3 = arith.addi %0, %2 : vector<24x128xi32>
    %c0 = arith.constant 0 : index
    %4 = memref.load %arg1[%c0] : memref<1xi32, #tpu.memory_space<smem>>
    %5 = vector.broadcast %4 : i32 to vector<24x128xi32>
    %6 = arith.cmpi slt, %3, %5 : vector<24x128xi32>
    %c0_0 = arith.constant 0 : index
    %c0_1 = arith.constant 0 : index
    %7 = vector.load %arg2[%c0_0, %c0_1] : memref<24x128xf32, #tpu.memory_space<vmem>>, vector<24x128xf32>
    %c0_2 = arith.constant 0 : index
    %c0_3 = arith.constant 0 : index
    %8 = vector.load %arg3[%c0_2, %c0_3] : memref<24x128xf32, #tpu.memory_space<vmem>>, vector<24x128xf32>
    %9 = math.absf %8 : vector<24x128xf32>
    %c0_4 = arith.constant 0 : index
    %c0_5 = arith.constant 0 : index
    %10 = vector.load %arg4[%c0_4, %c0_5] : memref<24x128xf32, #tpu.memory_space<vmem>>, vector<24x128xf32>
    %11 = math.absf %10 : vector<24x128xf32>
    %cst = arith.constant 0x7F800000 : f32
    %12 = vector.broadcast %cst : f32 to vector<24x128xf32>
    %13 = arith.select %6, %7, %12 : vector<24x128xi1>, vector<24x128xf32>
    %14 = vector.shape_cast %13 : vector<24x128xf32> to vector<3x8x128xf32>
    %cst_6 = arith.constant dense<0x7F800000> : vector<8x128xf32>
    %15 = vector.multi_reduction <minimumf>, %14, %cst_6 [0] : vector<3x8x128xf32> to vector<8x128xf32>
    %c0_7 = arith.constant 0 : index
    %c0_8 = arith.constant 0 : index
    %c0_9 = arith.constant 0 : index
    %c0_10 = arith.constant 0 : index
    %16 = vector.load %arg5[%c0_7, %c0_8, %c0_9, %c0_10] : memref<1x6x8x128xf32, #tpu.memory_space<vmem>>, vector<1x1x8x128xf32>
    %17 = vector.shape_cast %16 : vector<1x1x8x128xf32> to vector<8x128xf32>
    %18 = vector.shape_cast %15 : vector<8x128xf32> to vector<1x1x8x128xf32>
    tpu.vector_store %arg5[%c0_7, %c0_8, %c0_9, %c0_10], %18 {strides = array<i32>} : memref<1x6x8x128xf32, #tpu.memory_space<vmem>>, vector<1x1x8x128xf32>,
    %cst_11 = arith.constant 0xFF800000 : f32
    %19 = vector.broadcast %cst_11 : f32 to vector<24x128xf32>
    %20 = arith.select %6, %7, %19 : vector<24x128xi1>, vector<24x128xf32>
    %21 = vector.shape_cast %20 : vector<24x128xf32> to vector<3x8x128xf32>
    %cst_12 = arith.constant dense<0xFF800000> : vector<8x128xf32>
    %22 = vector.multi_reduction <maximumf>, %21, %cst_12 [0] : vector<3x8x128xf32> to vector<8x128xf32>
    %c0_13 = arith.constant 0 : index
    %c1 = arith.constant 1 : index
    %c0_14 = arith.constant 0 : index
    %c0_15 = arith.constant 0 : index
    %23 = vector.load %arg5[%c0_13, %c1, %c0_14, %c0_15] : memref<1x6x8x128xf32, #tpu.memory_space<vmem>>, vector<1x1x8x128xf32>
    %24 = vector.shape_cast %23 : vector<1x1x8x128xf32> to vector<8x128xf32>
    %25 = vector.shape_cast %22 : vector<8x128xf32> to vector<1x1x8x128xf32>
    tpu.vector_store %arg5[%c0_13, %c1, %c0_14, %c0_15], %25 {strides = array<i32>} : memref<1x6x8x128xf32, #tpu.memory_space<vmem>>, vector<1x1x8x128xf32>,
    %cst_16 = arith.constant 0x7F800000 : f32
    %26 = vector.broadcast %cst_16 : f32 to vector<24x128xf32>
    %27 = arith.select %6, %9, %26 : vector<24x128xi1>, vector<24x128xf32>
    %28 = vector.shape_cast %27 : vector<24x128xf32> to vector<3x8x128xf32>
    %cst_17 = arith.constant dense<0x7F800000> : vector<8x128xf32>
    %29 = vector.multi_reduction <minimumf>, %28, %cst_17 [0] : vector<3x8x128xf32> to vector<8x128xf32>
    %c0_18 = arith.constant 0 : index
    %c2 = arith.constant 2 : index
    %c0_19 = arith.constant 0 : index
    %c0_20 = arith.constant 0 : index
    %30 = vector.load %arg5[%c0_18, %c2, %c0_19, %c0_20] : memref<1x6x8x128xf32, #tpu.memory_space<vmem>>, vector<1x1x8x128xf32>
    %31 = vector.shape_cast %30 : vector<1x1x8x128xf32> to vector<8x128xf32>
    %32 = vector.shape_cast %29 : vector<8x128xf32> to vector<1x1x8x128xf32>
    tpu.vector_store %arg5[%c0_18, %c2, %c0_19, %c0_20], %32 {strides = array<i32>} : memref<1x6x8x128xf32, #tpu.memory_space<vmem>>, vector<1x1x8x128xf32>,
    %cst_21 = arith.constant 0xFF800000 : f32
    %33 = vector.broadcast %cst_21 : f32 to vector<24x128xf32>
    %34 = arith.select %6, %9, %33 : vector<24x128xi1>, vector<24x128xf32>
    %35 = vector.shape_cast %34 : vector<24x128xf32> to vector<3x8x128xf32>
    %cst_22 = arith.constant dense<0xFF800000> : vector<8x128xf32>
    %36 = vector.multi_reduction <maximumf>, %35, %cst_22 [0] : vector<3x8x128xf32> to vector<8x128xf32>
    %c0_23 = arith.constant 0 : index
    %c3 = arith.constant 3 : index
    %c0_24 = arith.constant 0 : index
    %c0_25 = arith.constant 0 : index
    %37 = vector.load %arg5[%c0_23, %c3, %c0_24, %c0_25] : memref<1x6x8x128xf32, #tpu.memory_space<vmem>>, vector<1x1x8x128xf32>
    %38 = vector.shape_cast %37 : vector<1x1x8x128xf32> to vector<8x128xf32>
    %39 = vector.shape_cast %36 : vector<8x128xf32> to vector<1x1x8x128xf32>
    tpu.vector_store %arg5[%c0_23, %c3, %c0_24, %c0_25], %39 {strides = array<i32>} : memref<1x6x8x128xf32, #tpu.memory_space<vmem>>, vector<1x1x8x128xf32>,
    %cst_26 = arith.constant 0x7F800000 : f32
    %40 = vector.broadcast %cst_26 : f32 to vector<24x128xf32>
    %41 = arith.select %6, %11, %40 : vector<24x128xi1>, vector<24x128xf32>
    %42 = vector.shape_cast %41 : vector<24x128xf32> to vector<3x8x128xf32>
    %cst_27 = arith.constant dense<0x7F800000> : vector<8x128xf32>
    %43 = vector.multi_reduction <minimumf>, %42, %cst_27 [0] : vector<3x8x128xf32> to vector<8x128xf32>
    %c0_28 = arith.constant 0 : index
    %c4 = arith.constant 4 : index
    %c0_29 = arith.constant 0 : index
    %c0_30 = arith.constant 0 : index
    %44 = vector.load %arg5[%c0_28, %c4, %c0_29, %c0_30] : memref<1x6x8x128xf32, #tpu.memory_space<vmem>>, vector<1x1x8x128xf32>
    %45 = vector.shape_cast %44 : vector<1x1x8x128xf32> to vector<8x128xf32>
    %46 = vector.shape_cast %43 : vector<8x128xf32> to vector<1x1x8x128xf32>
    tpu.vector_store %arg5[%c0_28, %c4, %c0_29, %c0_30], %46 {strides = array<i32>} : memref<1x6x8x128xf32, #tpu.memory_space<vmem>>, vector<1x1x8x128xf32>,
    %cst_31 = arith.constant 0xFF800000 : f32
    %47 = vector.broadcast %cst_31 : f32 to vector<24x128xf32>
    %48 = arith.select %6, %11, %47 : vector<24x128xi1>, vector<24x128xf32>
    %49 = vector.shape_cast %48 : vector<24x128xf32> to vector<3x8x128xf32>
    %cst_32 = arith.constant dense<0xFF800000> : vector<8x128xf32>
    %50 = vector.multi_reduction <maximumf>, %49, %cst_32 [0] : vector<3x8x128xf32> to vector<8x128xf32>
    %c0_33 = arith.constant 0 : index
    %c5 = arith.constant 5 : index
    %c0_34 = arith.constant 0 : index
    %c0_35 = arith.constant 0 : index
    %51 = vector.load %arg5[%c0_33, %c5, %c0_34, %c0_35] : memref<1x6x8x128xf32, #tpu.memory_space<vmem>>, vector<1x1x8x128xf32>
    %52 = vector.shape_cast %51 : vector<1x1x8x128xf32> to vector<8x128xf32>
    %53 = vector.shape_cast %50 : vector<8x128xf32> to vector<1x1x8x128xf32>
    tpu.vector_store %arg5[%c0_33, %c5, %c0_34, %c0_35], %53 {strides = array<i32>} : memref<1x6x8x128xf32, #tpu.memory_space<vmem>>, vector<1x1x8x128xf32>,
    return
  }
  func.func @transform_0(%arg0: i32, %arg1: memref<1xi32, #tpu.memory_space<smem>>) -> (i32, i32) {
    %c0_i32 = arith.constant 0 : i32
    %c0_i32_0 = arith.constant 0 : i32
    return %arg0, %c0_i32 : i32, i32
  }
  func.func @transform_1(%arg0: i32, %arg1: memref<1xi32, #tpu.memory_space<smem>>) -> (i32, i32) {
    %c0_i32 = arith.constant 0 : i32
    %c0_i32_0 = arith.constant 0 : i32
    return %arg0, %c0_i32 : i32, i32
  }
  func.func @transform_2(%arg0: i32, %arg1: memref<1xi32, #tpu.memory_space<smem>>) -> (i32, i32) {
    %c0_i32 = arith.constant 0 : i32
    %c0_i32_0 = arith.constant 0 : i32
    return %arg0, %c0_i32 : i32, i32
  }
  func.func @transform_3(%arg0: i32, %arg1: memref<1xi32, #tpu.memory_space<smem>>) -> (i32, i32, i32, i32) {
    %c0_i32 = arith.constant 0 : i32
    %c0_i32_0 = arith.constant 0 : i32
    %c0_i32_1 = arith.constant 0 : i32
    %c0_i32_2 = arith.constant 0 : i32
    return %arg0, %c0_i32, %c0_i32_0, %c0_i32_1 : i32, i32, i32, i32
  }
}

module attributes {stable_mosaic.version = 11 : i64} {
  func.func @_mutate_kernel(%arg0: i32, %arg1: memref<4xf32, #tpu.memory_space<smem>>, %arg2: memref<24x128xf32, #tpu.memory_space<vmem>>, %arg3: memref<24x128xf32, #tpu.memory_space<vmem>>, %arg4: memref<24x128xf32, #tpu.memory_space<vmem>>, %arg5: memref<3x24x128xf32, #tpu.memory_space<vmem>>, %arg6: memref<24x128xf32, #tpu.memory_space<vmem>>) attributes {dimension_semantics = [#tpu.dimension_semantics<parallel>], iteration_bounds = array<i64: 1>, scalar_prefetch = 1 : i64, scratch_operands = 0 : i64, tpu.core_type = #tpu.core_type<tc>, window_params = [{transform_indices = @transform_0, window_bounds = array<i64: 24, 128>}, {transform_indices = @transform_1, window_bounds = array<i64: 24, 128>}, {transform_indices = @transform_2, window_bounds = array<i64: 24, 128>}, {transform_indices = @transform_3, window_bounds = array<i64: 3, 24, 128>}, {transform_indices = @transform_4, window_bounds = array<i64: 24, 128>}]} {
    %c0 = arith.constant 0 : index
    %c0_0 = arith.constant 0 : index
    %0 = vector.load %arg2[%c0, %c0_0] : memref<24x128xf32, #tpu.memory_space<vmem>>, vector<24x128xf32>
    %c0_1 = arith.constant 0 : index
    %c0_2 = arith.constant 0 : index
    %1 = vector.load %arg3[%c0_1, %c0_2] : memref<24x128xf32, #tpu.memory_space<vmem>>, vector<24x128xf32>
    %2 = math.absf %1 : vector<24x128xf32>
    %c0_3 = arith.constant 0 : index
    %c0_4 = arith.constant 0 : index
    %3 = vector.load %arg4[%c0_3, %c0_4] : memref<24x128xf32, #tpu.memory_space<vmem>>, vector<24x128xf32>
    %4 = math.absf %3 : vector<24x128xf32>
    %c0_5 = arith.constant 0 : index
    %5 = memref.load %arg1[%c0_5] : memref<4xf32, #tpu.memory_space<smem>>
    %6 = vector.broadcast %5 : f32 to vector<24x128xf32>
    %7 = arith.mulf %0, %6 : vector<24x128xf32>
    %c1 = arith.constant 1 : index
    %8 = memref.load %arg1[%c1] : memref<4xf32, #tpu.memory_space<smem>>
    %9 = vector.broadcast %8 : f32 to vector<24x128xf32>
    %10 = arith.addf %7, %9 : vector<24x128xf32>
    %11 = arith.mulf %2, %2 : vector<24x128xf32>
    %cst = arith.constant 4.000000e-01 : f32
    %12 = vector.broadcast %cst : f32 to vector<24x128xf32>
    %13 = arith.mulf %12, %11 : vector<24x128xf32>
    %14 = math.sin %2 : vector<24x128xf32>
    %cst_6 = arith.constant 3.000000e-01 : f32
    %15 = vector.broadcast %cst_6 : f32 to vector<24x128xf32>
    %16 = arith.mulf %15, %14 : vector<24x128xf32>
    %17 = arith.addf %13, %16 : vector<24x128xf32>
    %c2 = arith.constant 2 : index
    %18 = memref.load %arg1[%c2] : memref<4xf32, #tpu.memory_space<smem>>
    %19 = vector.broadcast %18 : f32 to vector<24x128xf32>
    %20 = arith.mulf %19, %2 : vector<24x128xf32>
    %21 = arith.addf %17, %20 : vector<24x128xf32>
    %22 = math.sqrt %4 : vector<24x128xf32>
    %cst_7 = arith.constant 4.000000e-01 : f32
    %23 = vector.broadcast %cst_7 : f32 to vector<24x128xf32>
    %24 = arith.mulf %23, %22 : vector<24x128xf32>
    %cst_8 = arith.constant 8.000000e-01 : f32
    %25 = vector.broadcast %cst_8 : f32 to vector<24x128xf32>
    %26 = math.powf %4, %25 : vector<24x128xf32>
    %cst_9 = arith.constant 3.000000e-01 : f32
    %27 = vector.broadcast %cst_9 : f32 to vector<24x128xf32>
    %28 = arith.mulf %27, %26 : vector<24x128xf32>
    %29 = arith.addf %24, %28 : vector<24x128xf32>
    %c3 = arith.constant 3 : index
    %30 = memref.load %arg1[%c3] : memref<4xf32, #tpu.memory_space<smem>>
    %cst_10 = arith.constant 1.000000e+00 : f32
    %31 = vector.broadcast %cst_10 : f32 to vector<24x128xf32>
    %32 = arith.subf %4, %31 : vector<24x128xf32>
    %33 = vector.broadcast %30 : f32 to vector<24x128xf32>
    %34 = arith.mulf %33, %32 : vector<24x128xf32>
    %35 = arith.addf %29, %34 : vector<24x128xf32>
    %c0_11 = arith.constant 0 : index
    %c0_12 = arith.constant 0 : index
    %c0_13 = arith.constant 0 : index
    %36 = vector.load %arg5[%c0_11, %c0_12, %c0_13] : memref<3x24x128xf32, #tpu.memory_space<vmem>>, vector<1x24x128xf32>
    %37 = vector.shape_cast %36 : vector<1x24x128xf32> to vector<24x128xf32>
    %38 = vector.shape_cast %10 : vector<24x128xf32> to vector<1x24x128xf32>
    tpu.vector_store %arg5[%c0_11, %c0_12, %c0_13], %38 {strides = array<i32>} : memref<3x24x128xf32, #tpu.memory_space<vmem>>, vector<1x24x128xf32>,
    %c1_14 = arith.constant 1 : index
    %c0_15 = arith.constant 0 : index
    %c0_16 = arith.constant 0 : index
    %39 = vector.load %arg5[%c1_14, %c0_15, %c0_16] : memref<3x24x128xf32, #tpu.memory_space<vmem>>, vector<1x24x128xf32>
    %40 = vector.shape_cast %39 : vector<1x24x128xf32> to vector<24x128xf32>
    %41 = vector.shape_cast %21 : vector<24x128xf32> to vector<1x24x128xf32>
    tpu.vector_store %arg5[%c1_14, %c0_15, %c0_16], %41 {strides = array<i32>} : memref<3x24x128xf32, #tpu.memory_space<vmem>>, vector<1x24x128xf32>,
    %c2_17 = arith.constant 2 : index
    %c0_18 = arith.constant 0 : index
    %c0_19 = arith.constant 0 : index
    %42 = vector.load %arg5[%c2_17, %c0_18, %c0_19] : memref<3x24x128xf32, #tpu.memory_space<vmem>>, vector<1x24x128xf32>
    %43 = vector.shape_cast %42 : vector<1x24x128xf32> to vector<24x128xf32>
    %44 = vector.shape_cast %35 : vector<24x128xf32> to vector<1x24x128xf32>
    tpu.vector_store %arg5[%c2_17, %c0_18, %c0_19], %44 {strides = array<i32>} : memref<3x24x128xf32, #tpu.memory_space<vmem>>, vector<1x24x128xf32>,
    %45 = arith.addf %10, %21 : vector<24x128xf32>
    %46 = arith.addf %45, %35 : vector<24x128xf32>
    %cst_20 = arith.constant 0.333333343 : f32
    %47 = vector.broadcast %cst_20 : f32 to vector<24x128xf32>
    %48 = arith.mulf %46, %47 : vector<24x128xf32>
    %c0_21 = arith.constant 0 : index
    %c0_22 = arith.constant 0 : index
    %49 = vector.load %arg6[%c0_21, %c0_22] : memref<24x128xf32, #tpu.memory_space<vmem>>, vector<24x128xf32>
    tpu.vector_store %arg6[%c0_21, %c0_22], %48 {strides = array<i32>} : memref<24x128xf32, #tpu.memory_space<vmem>>, vector<24x128xf32>,
    return
  }
  func.func @transform_0(%arg0: i32, %arg1: memref<4xf32, #tpu.memory_space<smem>>) -> (i32, i32) {
    %c0_i32 = arith.constant 0 : i32
    %c0_i32_0 = arith.constant 0 : i32
    return %arg0, %c0_i32 : i32, i32
  }
  func.func @transform_1(%arg0: i32, %arg1: memref<4xf32, #tpu.memory_space<smem>>) -> (i32, i32) {
    %c0_i32 = arith.constant 0 : i32
    %c0_i32_0 = arith.constant 0 : i32
    return %arg0, %c0_i32 : i32, i32
  }
  func.func @transform_2(%arg0: i32, %arg1: memref<4xf32, #tpu.memory_space<smem>>) -> (i32, i32) {
    %c0_i32 = arith.constant 0 : i32
    %c0_i32_0 = arith.constant 0 : i32
    return %arg0, %c0_i32 : i32, i32
  }
  func.func @transform_3(%arg0: i32, %arg1: memref<4xf32, #tpu.memory_space<smem>>) -> (i32, i32, i32) {
    %c0_i32 = arith.constant 0 : i32
    %c0_i32_0 = arith.constant 0 : i32
    %c0_i32_1 = arith.constant 0 : i32
    return %c0_i32, %arg0, %c0_i32_0 : i32, i32, i32
  }
  func.func @transform_4(%arg0: i32, %arg1: memref<4xf32, #tpu.memory_space<smem>>) -> (i32, i32) {
    %c0_i32 = arith.constant 0 : i32
    %c0_i32_0 = arith.constant 0 : i32
    return %arg0, %c0_i32 : i32, i32
  }
}

</mosaic_0001>

<bundles_post_ra>
// kernel: generator_forward.2
= control target key start
LH: loop header
LB: loop body
LE: loop exit
PB: predicated region body
PF: predicated region fallthrough
CT: control target
= control target key end

     0   :  { %10 = vsyncpa [#allocation5], 0  ;;  %s364_s0 = inlined_call_operand.<no memory space> [shape: s32[1], index: 0, kind: input, shape index: {}]   ;;  %s365_s1 = inlined_call_operand.hbm [shape: f32[24,128], index: 1, kind: input, shape index: {}]   ;;  %s366_s2 = inlined_call_operand.hbm [shape: f32[24,128], index: 2, kind: input, shape index: {}]   ;;  %s367_s3 = inlined_call_operand.hbm [shape: f32[24,128], index: 3, kind: input, shape index: {}]   ;;  %s368_s4 = inlined_call_operand.vmem [shape: f32[1,6,8,128], index: 4, kind: output, shape index: {}]  }
   0x1   :  { %11 = vsyncpa [#allocation7], 0  ;;  %s213_s15 = smov [#allocation6]   ;;  %s214_s17 = smov [#allocation4]  }
   0x2   :  { %s29_s16 = sshll.u32 %s213_s15, 4  ;;  %s17_s18 = sshll.u32 %s214_s17, 4  ;;  %s30_s16 = int_to_ptr.vmem [resolvable:$true] %s29_s16  ;;  %s243_s18 = int_to_ptr.vmem [resolvable:$true] %s17_s18 }
   0x3   :  { %s143_s21 = scalar_lea.hbm %s366_s2, 384 }
   0x4   :  { %p144_p0 = scmp.ne.s32.totalorder %s366_s2, %s143_s21  ;;  %p147_p1 = scmp.lt.u32.totalorder %s143_s21, %s366_s2 }
   0x6   :  { %p149_p2 = pnand %p147_p1, %p144_p0 }
   0x8   :  { %152 = shalt.err (!%p149_p2)
}
   0x9   :  { %s153_s26 = scalar_lea.vmem %s30_s16, 384  ;;  %p158_p4 = scmp.lt.s32.totalorder %s30_s16, %s30_s16 }
   0xa   :  { %p154_p3 = scmp.ne.s32.totalorder %s30_s16, %s153_s26  ;;  %p159_p5 = scmp.lt.s32.totalorder %s153_s26, %s153_s26 }
   0xc   :  { %p160_p6 = por %p159_p5, %p158_p4 }
   0xe   :  { %p161_p7 = pnand %p160_p6, %p154_p3 }
  0x10   :  { %164 = shalt.err (!%p161_p7)
}
  0x11   :  { %s215_s27 = smov 128   ;;  %s216_s28 = smov 8  }
  0x12   :  { %35 = dma.hbm_to_vmem [thread:$0]  %s366_s2, 384, %s30_s16, [#allocation7], %s215_s27, %s215_s27, %s216_s28  }
  0x13   :  { %s165_s7 = scalar_lea.hbm %s365_s1, 384 }
  0x14   :  { %p166_p8 = scmp.ne.s32.totalorder %s365_s1, %s165_s7  ;;  %p169_p9 = scmp.lt.u32.totalorder %s165_s7, %s365_s1 }
  0x16   :  { %p171_p10 = pnand %p169_p9, %p166_p8 }
  0x18   :  { %174 = shalt.err (!%p171_p10)
}
  0x19   :  { %s175_s12 = scalar_lea.vmem %s243_s18, 384  ;;  %p180_p12 = scmp.lt.s32.totalorder %s243_s18, %s243_s18 }
  0x1a   :  { %p176_p11 = scmp.ne.s32.totalorder %s243_s18, %s175_s12  ;;  %p181_p13 = scmp.lt.s32.totalorder %s175_s12, %s175_s12 }
  0x1c   :  { %p182_p0 = por %p181_p13, %p180_p12 }
  0x1e   :  { %p183_p1 = pnand %p182_p0, %p176_p11 }
  0x20   :  { %186 = shalt.err (!%p183_p1)
}
  0x21   :  { %23 = dma.hbm_to_vmem [thread:$0]  %s365_s1, 384, %s243_s18, [#allocation5], %s215_s27, %s215_s27, %s216_s28  }
  0x22   :  { %s217_s14 = smov [#allocation8]   ;;  %s187_s19 = scalar_lea.hbm %s367_s3, 384 }
  0x23   :  { %s41_s15 = sshll.u32 %s217_s14, 4  ;;  %p188_p2 = scmp.ne.s32.totalorder %s367_s3, %s187_s19  ;;  %s42_s15 = int_to_ptr.vmem [resolvable:$true] %s41_s15 }
  0x24   :  { %p191_p3 = scmp.lt.u32.totalorder %s187_s19, %s367_s3 }
  0x26   :  { %p193_p4 = pnand %p191_p3, %p188_p2 }
  0x28   :  { %196 = shalt.err (!%p193_p4)
}
  0x29   :  { %s197_s24 = scalar_lea.vmem %s42_s15, 384  ;;  %p202_p6 = scmp.lt.s32.totalorder %s42_s15, %s42_s15 }
  0x2a   :  { %p198_p5 = scmp.ne.s32.totalorder %s42_s15, %s197_s24  ;;  %p203_p7 = scmp.lt.s32.totalorder %s197_s24, %s197_s24 }
  0x2c   :  { %p204_p8 = por %p203_p7, %p202_p6 }
  0x2e   :  { %p205_p9 = pnand %p204_p8, %p198_p5 }
  0x30   :  { %208 = shalt.err (!%p205_p9)
}
  0x31   :  { %47 = dma.hbm_to_vmem [thread:$0]  %s367_s3, 384, %s42_s15, [#allocation7], %s215_s27, %s215_s27, %s216_s28  }
  0x32   :  { %209 = dma.done.wait [#allocation5], 384  }
  0x33   :  { %210 = vsyncadd [#allocation5], 4294966912 }
  0x34   :  { %211 = dma.done.wait [#allocation7], 768  }
  0x35   :  { %212 = vsyncadd [#allocation7], 4294966528  ;;  %v57_v0 = vlaneseq  ;;  %v67_v2 = vstv %s364_s0  ;;  %v71_v8 = vld [vmem:[#allocation4] sm:$0xff]  ;;  %v72_v9 = vld [vmem:[#allocation4 + $0x8] sm:$0xff] }
  0x36   :  { %v73_v10 = vld [vmem:[#allocation4 + $0x10] sm:$0xff]  ;;  %v74_v15 = vld [vmem:[#allocation6] sm:$0xff]  ;;  %v75_v16 = vld [vmem:[#allocation6 + $0x8] sm:$0xff] }
  0x37   :  { %v58_v1 = vshrl.u32 %v57_v0, 7  ;;  %v76_v20 = vld [vmem:[#allocation6 + $0x10] sm:$0xff]  ;;  %v77_v21 = vand.u32 2147483647, %v74_v15  ;;  %v80_v22 = vld [vmem:[#allocation8] sm:$0xff]  ;;  %v81_v26 = vld [vmem:[#allocation8 + $0x8] sm:$0xff] }
  0x38   :  { %v78_v24 = vand.u32 2147483647, %v75_v16  ;;  %v79_v25 = vand.u32 2147483647, %v76_v20  ;;  %v82_v30 = vld [vmem:[#allocation8 + $0x10] sm:$0xff] }
  0x39   :  { %v59_v3 = vadd.s32 8, %v58_v1  ;;  %v60_v4 = vadd.s32 16, %v58_v1  ;;  %vm298_vm0 = vcmp.lt.s32.totalorder %v58_v1, %v67_v2  ;;  %v83_v31 = vand.u32 2147483647, %v80_v22 }
  0x3a   :  { %v86_v11 = vsel %vm298_vm0, %v71_v8, inf  ;;  %v92_v14 = vsel %vm298_vm0, %v71_v8, -inf  ;;  %v99_v28 = vsel %vm298_vm0, %v77_v21, inf  ;;  %v106_v29 = vsel %vm298_vm0, %v77_v21, -inf }
  0x3b   :  { %vm302_vm1 = vcmp.lt.s32.totalorder %v59_v3, %v67_v2  ;;  %vm306_vm2 = vcmp.lt.s32.totalorder %v60_v4, %v67_v2  ;;  %v84_v39 = vand.u32 2147483647, %v81_v26  ;;  %v85_v40 = vand.u32 2147483647, %v82_v30 }
  0x3c   :  { %v87_v12 = vsel %vm302_vm1, %v72_v9, inf  ;;  %v88_v13 = vsel %vm306_vm2, %v73_v10, inf  ;;  %v93_v18 = vsel %vm302_vm1, %v72_v9, -inf  ;;  %v94_v19 = vsel %vm306_vm2, %v73_v10, -inf }
  0x3d   :  { %v89_v17 = vmin.f32 %v86_v11, %v87_v12  ;;  %v95_v23 = vmax.f32 %v92_v14, %v93_v18  ;;  %v100_v33 = vsel %vm302_vm1, %v78_v24, inf  ;;  %v101_v34 = vsel %vm306_vm2, %v79_v25, inf }
  0x3e   :  { %v107_v35 = vsel %vm302_vm1, %v78_v24, -inf  ;;  %v102_v36 = vmin.f32 %v99_v28, %v100_v33  ;;  %v108_v37 = vsel %vm306_vm2, %v79_v25, -inf  ;;  %v113_v41 = vsel %vm298_vm0, %v83_v31, inf }
  0x3f   :  { %v90_v27 = vmin.f32 %v89_v17, %v88_v13  ;;  %v96_v32 = vmax.f32 %v95_v23, %v94_v19  ;;  %v109_v38 = vmax.f32 %v106_v29, %v107_v35  ;;  %v120_v42 = vsel %vm298_vm0, %v83_v31, -inf }
  0x40   :  { %v103_v43 = vmin.f32 %v102_v36, %v101_v34  ;;  %v114_v45 = vsel %vm302_vm1, %v84_v39, inf  ;;  %v121_v46 = vsel %vm302_vm1, %v84_v39, -inf  ;;  %v115_v47 = vsel %vm306_vm2, %v85_v40, inf }
  0x41   :  { %91 = vst [vmem:[%s368_s4] sm:$0xff] %v90_v27  ;;  %133 = vst [vmem:[%s368_s4 + $0x8] sm:$0xff] %v96_v32  ;;  %v110_v44 = vmax.f32 %v109_v38, %v108_v37  ;;  %v116_v48 = vmin.f32 %v113_v41, %v114_v45  ;;  %v122_v49 = vsel %vm306_vm2, %v85_v40, -inf  ;;  %v123_v50 = vmax.f32 %v120_v42, %v121_v46 }
  0x42   :  { %134 = vst [vmem:[%s368_s4 + $0x10] sm:$0xff] %v103_v43 }
  0x43   :  { %135 = vst [vmem:[%s368_s4 + $0x18] sm:$0xff] %v110_v44  ;;  %v117_v51 = vmin.f32 %v116_v48, %v115_v47  ;;  %v124_v52 = vmax.f32 %v123_v50, %v122_v49 }
  0x45   :  { %136 = vst [vmem:[%s368_s4 + $0x20] sm:$0xff] %v117_v51  ;;  %137 = vst [vmem:[%s368_s4 + $0x28] sm:$0xff] %v124_v52 }
  0x46   :  { %131 = vsyncpa [#allocation5], 1 }
  0x47   :  { %132 = vsyncpa [#allocation7], 1 }

// kernel: generator_forward.3
= control target key start
LH: loop header
LB: loop body
LE: loop exit
PB: predicated region body
PF: predicated region fallthrough
CT: control target
= control target key end

     0   :  { %s1085_s0 = inlined_call_operand.vmem [shape: f32[4], index: 0, kind: input, shape index: {}]   ;;  %s1086_s1 = inlined_call_operand.vmem [shape: f32[24,128], index: 1, kind: input, shape index: {}]   ;;  %s1087_s2 = inlined_call_operand.vmem [shape: f32[24,128], index: 2, kind: input, shape index: {}]   ;;  %s1088_s3 = inlined_call_operand.vmem [shape: f32[24,128], index: 3, kind: input, shape index: {}]   ;;  %s1089_s4 = inlined_call_operand.hbm [shape: f32[3,24,128], index: 4, kind: output, shape index: {0}]   ;;  %s1090_s5 = inlined_call_operand.hbm [shape: f32[24,128], index: 5, kind: output, shape index: {1}]  }
   0x1   :  { %s11_s20 = sshll.u32 %s1085_s0, 4  ;;  %s12_s20 = int_to_ptr.vmem [resolvable:$true] %s11_s20 }
   0x2   :  { %s618_s21 = scalar_lea.vmem %s12_s20, 16  ;;  %p623_p1 = scmp.lt.s32.totalorder %s12_s20, %s12_s20 }
   0x3   :  { %p619_p0 = scmp.ne.s32.totalorder %s12_s20, %s618_s21  ;;  %p624_p2 = scmp.lt.s32.totalorder %s618_s21, %s618_s21 }
   0x5   :  { %p625_p3 = por %p624_p2, %p623_p1 }
   0x7   :  { %p626_p4 = pnand %p625_p3, %p619_p0 }
   0x9   :  { %629 = shalt.err (!%p626_p4)  }
   0xa   :  { %s680_s22 = smov [#allocation3]  }
   0xb   :  { %14 = dma.vmem_to_smem %s12_s20, 16, %s680_s22, [#allocation2] }
   0xc   :  { %674 = dma.done.wait [#allocation2], 16 }
   0xd   :  { %675 = vsyncadd [#allocation2], 4294967280 }
   0xe   :  { %16 = sfence }
   0xf   :  { %17 = vsyncpa [#allocation5], 0  ;;  %s40_s23 = sld [smem:[#allocation3]]  ;;  %s472_s24 = sld [smem:[#allocation3 + $0x1]]  ;;  %v28_v0 = vld [vmem:[%s1087_s2] sm:$0xff]  ;;  %v26_v3 = vld [vmem:[%s1086_s1 + $0x8] sm:$0xff] }
  0x10   :  { %v727_v1 = vand.u32 2147483647, %v28_v0  ;;  %v25_v2 = vld [vmem:[%s1086_s1] sm:$0xff]  ;;  %v27_v4 = vld [vmem:[%s1086_s1 + $0x10] sm:$0xff]  ;;  %v29_v6 = vld [vmem:[%s1087_s2 + $0x8] sm:$0xff] }
  0x11   :  { %v742_v7 = vand.u32 2147483647, %v29_v6 }
  0x12   :  { %v58_v5 = vand.u32 2139095040, %v727_v1  ;;  %v62_v14 = vand.u32 8388607, %v727_v1 }
  0x14   :  { %v59_v10 = vshrl.u32 %v58_v5, 23 }
  0x15   :  { %v41_v8 = vstv %s40_s23  ;;  %v46_v9 = vstv %s472_s24 }
  0x16   :  { %v42_v11 = vmul.f32 %v41_v8, %v25_v2  ;;  %v43_v12 = vmul.f32 %v41_v8, %v26_v3  ;;  %v44_v13 = vmul.f32 %v41_v8, %v27_v4 }
  0x17   :  { %18 = vsyncpa [#allocation7], 0  ;;  %v473_v15 = vadd.s32 4294967169, %v59_v10  ;;  %v159_v16 = vand.u32 2139095040, %v742_v7  ;;  %v63_v22 = vor.u32 8388608, %v62_v14  ;;  %v30_v25 = vld [vmem:[%s1087_s2 + $0x10] sm:$0xff] }
  0x18   :  { %v746_v17 = vadd.f32 %v46_v9, %v42_v11  ;;  %v748_v18 = vadd.f32 %v46_v9, %v43_v12  ;;  %v750_v19 = vadd.f32 %v46_v9, %v44_v13  ;;  %v163_v23 = vand.u32 8388607, %v742_v7  ;;  %s896_s11 = sld [smem:[#allocation3 + $0x2]]  ;;  %s928_s14 = sld [smem:[#allocation3 + $0x3]] }
  0x19   :  { %v65_v20 = vadd.s32 1, %v473_v15  ;;  %v160_v21 = vshrl.u32 %v159_v16, 23  ;;  %v759_v30 = vshll.u32 %v63_v22, 8  ;;  %v761_v32 = vand.u32 2147483647, %v30_v25  ;;  %s688_s18 = smov [#allocation6]  }
  0x1a   :  { %417 = vst [vmem:[#allocation4] sm:$0xff] %v746_v17  ;;  %418 = vst [vmem:[#allocation4 + $0x8] sm:$0xff] %v748_v18  ;;  %v164_v27 = vor.u32 8388608, %v163_v23  ;;  %v681_v34 = vmov 683565275   ;;  %s457_s19 = sshll.u32 %s688_s18, 4  ;;  %s458_s19 = int_to_ptr.vmem [resolvable:$true] %s457_s19 }
  0x1b   :  { %419 = vst [vmem:[#allocation4 + $0x10] sm:$0xff] %v750_v19  ;;  %vm66_vm0 = vcmp.gt.s32.totalorder %v65_v20, 0  ;;  %v477_v24 = vadd.s32 4294967169, %v160_v21  ;;  %v682_v36 = vmov 2475754826   ;;  %v260_v11 = vand.u32 2139095040, %v761_v32 }
  0x1c   :  { %v67_v26 = vsel %vm66_vm0, %v65_v20, 0  ;;  %v683_v38 = vmov 2131351028   ;;  %v684_v40 = vmov 2102212464   ;;  %v768_v44 = vshll.u32 %v164_v27, 8 }
  0x1d   :  { %v68_v28 = vshrl.u32 %v67_v26, 5  ;;  %v69_v29 = vand.u32 31, %v67_v26  ;;  %v166_v31 = vadd.s32 1, %v477_v24  ;;  %v685_v42 = vmov 920167782  }
  0x1e   :  { %v686_v50 = vmov 1326507024  }
  0x1f   :  { %v70_v33 = vsub.s32 32, %v69_v29  ;;  %v72_v35 = vshll.u32 %v681_v34, %v69_v29  ;;  %v75_v37 = vshll.u32 %v682_v36, %v69_v29  ;;  %v78_v39 = vshll.u32 %v683_v38, %v69_v29 }
  0x20   :  { %v81_v41 = vshll.u32 %v684_v40, %v69_v29  ;;  %v84_v43 = vshll.u32 %v685_v42, %v69_v29  ;;  %vm87_vm1 = vcmp.lt.s32.totalorder %v68_v28, 1  ;;  %vm88_vm2 = vcmp.lt.s32.totalorder %v68_v28, 2 }
  0x21   :  { %v71_v45 = vshrl.u32 %v681_v34, %v70_v33  ;;  %v73_v46 = vshrl.u32 %v682_v36, %v70_v33  ;;  %v76_v47 = vshrl.u32 %v683_v38, %v70_v33  ;;  %v79_v48 = vshrl.u32 %v684_v40, %v70_v33 }
  0x22   :  { %v82_v49 = vshrl.u32 %v685_v42, %v70_v33  ;;  %v85_v51 = vshrl.u32 %v686_v50, %v70_v33  ;;  %vm90_vm3 = vcmp.lt.s32.totalorder %v68_v28, 4  ;;  %vm167_vm4 = vcmp.gt.s32.totalorder %v166_v31, 0 }
  0x23   :  { %v74_v52 = vor.u32 %v73_v46, %v72_v35  ;;  %v77_v53 = vor.u32 %v76_v47, %v75_v37  ;;  %v80_v54 = vor.u32 %v79_v48, %v78_v39  ;;  %vm89_vm5 = vcmp.lt.s32.totalorder %v68_v28, 3 }
  0x24   :  { %v83_v55 = vor.u32 %v82_v49, %v81_v41  ;;  %v86_v56 = vor.u32 %v85_v51, %v84_v43  ;;  %v168_v57 = vsel %vm167_vm4, %v166_v31, 0  ;;  %v261_v43 = vshrl.u32 %v260_v11, 23 }
  0x25   :  { %v91_v58 = vsel %vm87_vm1, %v71_v45, %v74_v52  ;;  %v92_v59 = vsel %vm90_vm3, %v80_v54, 2102212464  ;;  %v95_v60 = vsel %vm87_vm1, %v74_v52, %v77_v53  ;;  %v99_v61 = vsel %vm87_vm1, %v77_v53, %v80_v54 }
  0x26   :  { %v93_v62 = vsel %vm89_vm5, %v77_v53, %v92_v59  ;;  %v96_v63 = vsel %vm90_vm3, %v83_v55, 920167782  ;;  %v100_v0 = vsel %vm90_vm3, %v86_v56, 1326507024  ;;  %v169_v2 = vshrl.u32 %v168_v57, 5 }
  0x27   :  { %v94_v3 = vsel %vm88_vm2, %v91_v58, %v93_v62  ;;  %v97_v4 = vsel %vm89_vm5, %v80_v54, %v96_v63  ;;  %v101_v5 = vsel %vm89_vm5, %v83_v55, %v100_v0  ;;  %v170_v6 = vand.u32 31, %v168_v57 }
  0x28   :  { %v98_v8 = vsel %vm88_vm2, %v95_v60, %v97_v4  ;;  %v102_v9 = vsel %vm88_vm2, %v99_v61, %v101_v5  ;;  %v110_v10 = vmul.u32 %v759_v30, %v94_v3  ;;  %vm188_vm6 = vcmp.lt.s32.totalorder %v169_v2, 1 }
  0x29   :  { %v785_v12 = vmul.u32.u64.low %v759_v30, %v102_v9  ;;  %v786_v13 = vmul.u32.u64.high %v759_v30, %v102_v9, %v785_v12  ;;  %v789_v14 = vmul.u32.u64.low %v759_v30, %v98_v8  ;;  %v790_v15 = vmul.u32.u64.high %v759_v30, %v98_v8, %v789_v14 }
  0x2a   :  { %v171_v16 = vsub.s32 32, %v170_v6  ;;  %v173_v20 = vshll.u32 %v681_v34, %v170_v6  ;;  %v176_v21 = vshll.u32 %v682_v36, %v170_v6  ;;  %v179_v22 = vshll.u32 %v683_v38, %v170_v6 }
  0x2b   :  { %v182_v23 = vshll.u32 %v684_v40, %v170_v6  ;;  %v185_v24 = vshll.u32 %v685_v42, %v170_v6  ;;  %vm189_vm7 = vcmp.lt.s32.totalorder %v169_v2, 2  ;;  %vm112_vm8 = vc.u32 %v786_v13, %v789_v14 }
  0x2c   :  { %v172_v25 = vshrl.u32 %v681_v34, %v171_v16  ;;  %v174_v26 = vshrl.u32 %v682_v36, %v171_v16  ;;  %v177_v27 = vshrl.u32 %v683_v38, %v171_v16  ;;  %v180_v28 = vshrl.u32 %v684_v40, %v171_v16 }
  0x2d   :  { %v113_v29 = vadd.s32 1, %v790_v15  ;;  %v183_v30 = vshrl.u32 %v685_v42, %v171_v16  ;;  %vm190_vm9 = vcmp.lt.s32.totalorder %v169_v2, 3  ;;  %v186_v37 = vshrl.u32 %v686_v50, %v171_v16 }
  0x2e   :  { %v175_v31 = vor.u32 %v174_v26, %v173_v20  ;;  %v178_v33 = vor.u32 %v177_v27, %v176_v21  ;;  %v181_v35 = vor.u32 %v180_v28, %v179_v22  ;;  %vm191_vm10 = vcmp.lt.s32.totalorder %v169_v2, 4  ;;  %v34_v27 = vld [vmem:[%s1088_s3] sm:$0xff] }
  0x2f   :  { %v114_v39 = vsel %vm112_vm8, %v113_v29, %v790_v15  ;;  %v184_v41 = vor.u32 %v183_v30, %v182_v23  ;;  %v187_v46 = vor.u32 %v186_v37, %v185_v24  ;;  %v481_v60 = vadd.s32 4294967169, %v261_v43 }
  0x30   :  { %v115_v45 = vadd.s32 %v114_v39, %v110_v10  ;;  %v192_v47 = vsel %vm188_vm6, %v172_v25, %v175_v31  ;;  %v193_v48 = vsel %vm191_vm10, %v181_v35, 2102212464  ;;  %v196_v51 = vsel %vm188_vm6, %v175_v31, %v178_v33 }
  0x31   :  { %v194_v49 = vsel %vm190_vm9, %v178_v33, %v193_v48  ;;  %v197_v52 = vsel %vm191_vm10, %v184_v41, 920167782  ;;  %v200_v53 = vsel %vm188_vm6, %v178_v33, %v181_v35  ;;  %v201_v56 = vsel %vm191_vm10, %v187_v46, 1326507024 }
  0x32   :  { %v812_v54 = vadd.s32 536870912, %v115_v45  ;;  %v198_v55 = vsel %vm190_vm9, %v181_v35, %v197_v52  ;;  %v195_v57 = vsel %vm189_vm7, %v192_v47, %v194_v49  ;;  %v202_v59 = vsel %vm190_vm9, %v184_v41, %v201_v56 }
  0x33   :  { %v199_v58 = vsel %vm189_vm7, %v196_v51, %v198_v55  ;;  %v203_v62 = vsel %vm189_vm7, %v200_v53, %v202_v59  ;;  %v267_v5 = vadd.s32 1, %v481_v60  ;;  %v211_v8 = vmul.u32 %v768_v44, %v195_v57 }
  0x34   :  { %v117_v61 = vshrl.u32 %v812_v54, 30  ;;  %v821_v63 = vmul.u32.u64.low %v768_v44, %v199_v58  ;;  %v822_v0 = vmul.u32.u64.high %v768_v44, %v199_v58, %v821_v63  ;;  %v264_v10 = vand.u32 8388607, %v761_v32 }
  0x35   :  { %v826_v3 = vmul.u32.u64.low %v768_v44, %v203_v62  ;;  %v827_v4 = vmul.u32.u64.high %v768_v44, %v203_v62, %v826_v3  ;;  %vm268_vm11 = vcmp.gt.s32.totalorder %v267_v5, 0  ;;  %v111_v41 = vadd.s32 %v789_v14, %v786_v13 }
  0x36   :  { %v118_v6 = vshll.u32 %v117_v61, 30  ;;  %v214_v2 = vadd.s32 1, %v822_v0  ;;  %v269_v11 = vsel %vm268_vm11, %v267_v5, 0  ;;  %v265_v22 = vor.u32 8388608, %v264_v10 }
  0x37   :  { %vm213_vm12 = vc.u32 %v827_v4, %v821_v63  ;;  %v271_v16 = vand.u32 31, %v269_v11  ;;  %v270_v44 = vshrl.u32 %v269_v11, 5  ;;  %v855_v46 = vand.u32 2147483647, %v34_v27 }
  0x38   :  { %v119_v9 = vsub.s32 %v115_v45, %v118_v6  ;;  %v215_v15 = vsel %vm213_vm12, %v214_v2, %v822_v0  ;;  %v853_v45 = vshll.u32 %v265_v22, 8  ;;  %vm57_vm2 = vcmp.le.f32.partialorder %v727_v1, 0.7853982 }
  0x39   :  { %v216_v20 = vadd.s32 %v215_v15, %v211_v8  ;;  %v272_v23 = vsub.s32 32, %v271_v16  ;;  %v274_v25 = vshll.u32 %v681_v34, %v271_v16  ;;  %v277_v26 = vshll.u32 %v682_v36, %v271_v16 }
  0x3a   :  { %v121_v12 = vsub.s32 0, %v119_v9  ;;  %v280_v31 = vshll.u32 %v683_v38, %v271_v16  ;;  %v283_v37 = vshll.u32 %v684_v40, %v271_v16  ;;  %v286_v47 = vshll.u32 %v685_v42, %v271_v16 }
  0x3b   :  { %v837_v24 = vadd.s32 536870912, %v216_v20  ;;  %v275_v29 = vshrl.u32 %v682_v36, %v272_v23  ;;  %v278_v30 = vshrl.u32 %v683_v38, %v272_v23  ;;  %v281_v35 = vshrl.u32 %v684_v40, %v272_v23 }
  0x3c   :  { %v474_v21 = vmin.u32 %v121_v12, %v119_v9  ;;  %v284_v39 = vshrl.u32 %v685_v42, %v272_v23  ;;  %v273_v38 = vshrl.u32 %v681_v34, %v272_v23  ;;  %v287_v48 = vshrl.u32 %v686_v50, %v272_v23 }
  0x3d   :  { %v218_v33 = vshrl.u32 %v837_v24, 30  ;;  %v276_v40 = vor.u32 %v275_v29, %v274_v25  ;;  %v279_v49 = vor.u32 %v278_v30, %v277_v26  ;;  %vm289_vm14 = vcmp.lt.s32.totalorder %v270_v44, 1 }
  0x3e   :  { %v123_v28 = vclz %v474_v21  ;;  %v282_v14 = vor.u32 %v281_v35, %v280_v31  ;;  %v285_v52 = vor.u32 %v284_v39, %v283_v37  ;;  %vm292_vm15 = vcmp.lt.s32.totalorder %v270_v44, 4 }
  0x3f   :  { %v219_v36 = vshll.u32 %v218_v33, 30  ;;  %v288_v34 = vor.u32 %v287_v48, %v286_v47  ;;  %vm291_vm0 = vcmp.lt.s32.totalorder %v270_v44, 3  ;;  %vm290_vm1 = vcmp.lt.s32.totalorder %v270_v44, 2 }
  0x40   :  { %v475_v43 = vadd.s32 4294967294, %v123_v28  ;;  %v294_v42 = vsel %vm292_vm15, %v282_v14, 2102212464  ;;  %v297_v59 = vsel %vm289_vm14, %v276_v40, %v279_v49  ;;  %v293_v62 = vsel %vm289_vm14, %v273_v38, %v276_v40 }
  0x41   :  { %v862_v13 = vsub.s32 %v216_v20, %v219_v36  ;;  %v295_v0 = vsel %vm291_vm0, %v279_v49, %v294_v42  ;;  %v298_v3 = vsel %vm292_vm15, %v285_v52, 920167782  ;;  %588 = vrsqrt.f32 %v855_v46 }
  0x42   :  { %vm476_vm13 = vcmp.lt.s32.totalorder %v475_v43, 0  ;;  %v299_v8 = vsel %vm291_vm0, %v282_v14, %v298_v3  ;;  %v301_v10 = vsel %vm289_vm14, %v279_v49, %v282_v14  ;;  %v302_v11 = vsel %vm292_vm15, %v288_v34, 1326507024 }
  0x43   :  { %v126_v51 = vsel %vm476_vm13, 0, %v475_v43  ;;  %v222_v57 = vsub.s32 0, %v862_v13  ;;  %v300_v2 = vsel %vm290_vm1, %v297_v59, %v299_v8  ;;  %v296_v16 = vsel %vm290_vm1, %v293_v62, %v295_v0  ;;  %v36_v62 = vld [vmem:[%s1088_s3 + $0x10] sm:$0xff] }
  0x44   :  { %v127_v53 = vsub.s32 32, %v126_v51  ;;  %v128_v55 = vshll.u32 %v119_v9, %v126_v51  ;;  %v131_v56 = vsub.s32 4294967266, %v126_v51  ;;  %v303_v20 = vsel %vm291_vm0, %v285_v52, %v302_v11 }
  0x45   :  { %v478_v60 = vmin.u32 %v222_v57, %v862_v13  ;;  %v304_v22 = vsel %vm290_vm1, %v301_v10, %v303_v20  ;;  %v880_v23 = vmul.u32.u64.low %v853_v45, %v300_v2  ;;  %v881_v25 = vmul.u32.u64.high %v853_v45, %v300_v2, %v880_v23 }
  0x46   :  { %v129_v50 = vshrl.u32 %v111_v41, %v127_v53  ;;  %v132_v58 = vadd.s32 127, %v131_v56  ;;  %v885_v27 = vmul.u32.u64.low %v853_v45, %v304_v22  ;;  %v886_v28 = vmul.u32.u64.high %v853_v45, %v304_v22, %v885_v27 }
  0x47   :  { %v224_v9 = vclz %v478_v60  ;;  %v212_v29 = vadd.s32 %v821_v63, %v827_v4  ;;  %590 = vlog2.f32 %v855_v46  ;;  %v142_v30 = vsel %vm57_vm2, 0, %v117_v61  ;;  %v35_v4 = vld [vmem:[%s1088_s3 + $0x8] sm:$0xff]  ;;  %s687_s3 = smov [#allocation4]  }
  0x48   :  { %v130_v5 = vor.u32 %v129_v50, %v128_v55  ;;  %v133_v6 = vshll.u32 %v132_v58, 23  ;;  %v312_v35 = vmul.u32 %v853_v45, %v296_v16  ;;  %v315_v63 = vadd.s32 1, %v881_v25  ;;  %s445_s17 = sshll.u32 %s687_s3, 4  ;;  %s446_s17 = int_to_ptr.vmem [resolvable:$true] %s445_s17 }
  0x49   :  { %v479_v21 = vadd.s32 4294967294, %v224_v9  ;;  %vm314_vm4 = vc.u32 %v886_v28, %v880_v23  ;;  %v146_v38 = vadd.s32 3, %v142_v30  ;;  %v910_v48 = vand.u32 2147483647, %v35_v4  ;;  %s630_s20 = scalar_lea.vmem %s446_s17, 1152  ;;  %p635_p6 = scmp.lt.s32.totalorder %s446_s17, %s446_s17 }
  0x4a   :  { %v134_v12 = vor.u32 4788187, %v133_v6  ;;  %v137_v15 = vcvt.s32.f32 %v130_v5  ;;  %v316_v45 = vsel %vm314_vm4, %v315_v63, %v881_v25  ;;  %v50_v40 = vmul.f32 %v727_v1, %v727_v1  ;;  %p631_p5 = scmp.ne.s32.totalorder %s446_s17, %s630_s20  ;;  %p636_p7 = scmp.lt.s32.totalorder %s630_s20, %s630_s20 }
  0x4b   :  { %vm480_vm3 = vcmp.lt.s32.totalorder %v479_v21, 0  ;;  %v589_v36 = vpop.eup %588  ;;  %v317_v47 = vadd.s32 %v316_v45, %v312_v35  ;;  %vm158_vm5 = vcmp.le.f32.partialorder %v742_v7, 0.7853982  ;;  %v51_v52 = vmul.f32 %v742_v7, %v742_v7 }
  0x4c   :  { %v135_v26 = vand.u32 2147483647, %v134_v12  ;;  %v227_v31 = vsel %vm480_vm3, 0, %v479_v21  ;;  %vm145_vm6 = vweird.f32 %v727_v1  ;;  %v147_v56 = vand.u32 3, %v146_v38  ;;  %p637_p8 = por %p636_p7, %p635_p6 }
  0x4d   :  { %v228_v37 = vsub.s32 32, %v227_v31  ;;  %v229_v39 = vshll.u32 %v862_v13, %v227_v31  ;;  %v232_v41 = vsub.s32 4294967266, %v227_v31  ;;  %v243_v13 = vsel %vm158_vm5, 0, %v218_v33 }
  0x4e   :  { %v138_v44 = vmul.f32 %v137_v15, %v135_v26  ;;  %v919_v14 = vadd.s32 536870912, %v317_v47  ;;  %v925_v57 = vstv %s896_s11  ;;  %v53_v33 = vmul.f32 0.4, %v50_v40  ;;  %p638_p9 = pnand %p637_p8, %p631_p5 }
  0x4f   :  { %v230_v61 = vshrl.u32 %v212_v29, %v228_v37  ;;  %v233_v43 = vadd.s32 127, %v232_v41  ;;  %v247_v50 = vadd.s32 3, %v243_v13  ;;  %v374_v58 = vmul.f32 %v589_v36, %v855_v46 }
  0x50   :  { %v141_v54 = vsel %vm57_vm2, %v727_v1, %v138_v44  ;;  %v319_v34 = vshrl.u32 %v919_v14, 30  ;;  %vm375_vm7 = vcmp.eq.f32.partialorder %v855_v46, inf  ;;  %v367_v0 = vmul.f32 %v925_v57, %v727_v1 }
  0x51   :  { %592 = vcosq.f32 %v141_v54  ;;  %v231_v49 = vor.u32 %v230_v61, %v229_v39  ;;  %v234_v51 = vshll.u32 %v233_v43, 23  ;;  %v591_v24 = vpop.eup %590  ;;  %v941_v3 = vmul.f32 0.4, %v51_v52 }
  0x52   :  { %594 = vsinq.f32 %v141_v54  ;;  %v320_v59 = vshll.u32 %v319_v34, 30  ;;  %v508_v60 = vmul.f32 0.8, %v591_v24  ;;  %vm377_vm8 = vcmp.eq.f32.partialorder %v855_v46, 0.0 }
  0x53   :  { %v235_v53 = vor.u32 4788187, %v234_v51  ;;  %v238_v55 = vcvt.s32.f32 %v231_v49  ;;  %596 = vlog2.f32 %v910_v48  ;;  %vm152_vm9 = vcmp.eq.s32.totalorder %v147_v56, 2 }
  0x54   :  { %598 = vrsqrt.f32 %v910_v48  ;;  %v944_v6 = vsub.s32 %v317_v47, %v320_v59  ;;  %v378_v8 = vand.u32 2147483648, %v855_v46  ;;  %v950_v10 = vand.u32 3, %v247_v50 }
  0x55   :  { %v236_v42 = vand.u32 2147483647, %v235_v53  ;;  %600 = vpow2.f32 %v508_v60  ;;  %v376_v11 = vsel %vm375_vm7, %v855_v46, %v374_v58  ;;  %v953_v12 = vand.u32 2147483647, %v36_v62 }
  0x56   :  { %vm149_vm10 = vcmp.eq.s32.totalorder %v147_v56, 0  ;;  %v323_v20 = vsub.s32 0, %v944_v6  ;;  %vm148_vm11 = vcmp.lt.s32.totalorder %v147_v56, 2  ;;  %v958_v22 = vmul.f32 %v925_v57, %v742_v7 }
  0x57   :  { %v239_v5 = vmul.f32 %v238_v55, %v236_v42  ;;  %v379_v27 = vsel %vm377_vm8, %v378_v8, %v376_v11  ;;  %v965_v29 = vstv %s928_s14  ;;  %vm250_vm12 = vcmp.eq.s32.totalorder %v950_v10, 0 }
  0x58   :  { %v482_v26 = vmin.u32 %v323_v20, %v944_v6  ;;  %vm253_vm13 = vcmp.eq.s32.totalorder %v950_v10, 2  ;;  %vm249_vm14 = vcmp.lt.s32.totalorder %v950_v10, 2  ;;  %vm510_vm15 = vcmp.lt.f32.partialorder %v855_v46, 0 }
  0x59   :  { %v242_v2 = vsel %vm158_vm5, %v742_v7, %v239_v5  ;;  %vm511_vm0 = vcmp.eq.f32.partialorder %v855_v46, 0  ;;  %vm246_vm1 = vweird.f32 %v742_v7  ;;  %v313_v39 = vadd.s32 %v880_v23, %v886_v28 }
  0x5a   :  { %602 = vcosq.f32 %v242_v2  ;;  %v325_v35 = vclz %v482_v26  ;;  %v394_v41 = vmul.f32 0.4, %v379_v27  ;;  %vm512_vm2 = vcmp.eq.f32.partialorder %v855_v46, 1065353216 }
  0x5b   :  { %v593_v9 = vpop.eup %592  ;;  %604 = vsinq.f32 %v242_v2  ;;  %vm514_vm3 = vcmp.eq.f32.partialorder %v855_v46, 2139095040  ;;  %vm522_vm4 = vcmp.ne.f32.partialorder %v855_v46, %v855_v46  ;;  %v487_v1 = vadd.f32 -1.0, %v855_v46 }
  0x5c   :  { %v595_v15 = vpop.eup %594  ;;  %v153_v16 = vxor.u32 2147483648, %v593_v9  ;;  %606 = vlog2.f32 %v953_v12  ;;  %v483_v61 = vadd.s32 4294967294, %v325_v35  ;;  %vm382_vm5 = vcmp.eq.f32.partialorder %v910_v48, inf }
  0x5d   :  { %v150_v21 = vxor.u32 2147483648, %v595_v15  ;;  %v597_v30 = vpop.eup %596  ;;  %vm384_vm7 = vcmp.eq.f32.partialorder %v910_v48, 0.0  ;;  %v385_v38 = vand.u32 2147483648, %v910_v48  ;;  %vm259_vm8 = vcmp.le.f32.partialorder %v761_v32, 0.7853982 }
  0x5e   :  { %v154_v25 = vsel %vm152_vm9, %v153_v16, %v595_v15  ;;  %v533_v63 = vmul.f32 0.8, %v597_v30  ;;  %v599_v4 = vpop.eup %598  ;;  %v411_v56 = vmul.f32 %v487_v1, %v965_v29  ;;  %vm535_vm9 = vcmp.lt.f32.partialorder %v910_v48, 0 }
  0x5f   :  { %v151_v44 = vsel %vm149_vm10, %v593_v9, %v150_v21  ;;  %v601_v43 = vpop.eup %600  ;;  %v381_v36 = vmul.f32 %v599_v4, %v910_v48  ;;  %vm536_vm10 = vcmp.eq.f32.partialorder %v910_v48, 0 }
  0x60   :  { %v155_v31 = vsel %vm148_vm11, %v151_v44, %v154_v25  ;;  %608 = vpow2.f32 %v533_v63  ;;  %v515_v28 = vsel %vm510_vm15, 2143289344, %v601_v43  ;;  %vm539_vm11 = vcmp.eq.f32.partialorder %v910_v48, 2139095040 }
  0x61   :  { %v156_v37 = vsel %vm145_vm6, nan, %v155_v31  ;;  %vm484_vm6 = vcmp.lt.s32.totalorder %v483_v61, 0  ;;  %610 = vrsqrt.f32 %v953_v12  ;;  %v516_v55 = vsel %vm511_vm0, 0, %v515_v28 }
  0x62   :  { %v359_v54 = vmul.f32 0.3, %v156_v37  ;;  %v328_v23 = vsel %vm484_vm6, 0, %v483_v61  ;;  %v521_v50 = vsel %vm514_vm3, 2139095040, %v516_v55  ;;  %v383_v62 = vsel %vm382_vm5, %v910_v48, %v381_v36 }
  0x63   :  { %v329_v49 = vsub.s32 32, %v328_v23  ;;  %v330_v51 = vshll.u32 %v944_v6, %v328_v23  ;;  %v333_v13 = vsub.s32 4294967266, %v328_v23  ;;  %v525_v60 = vsel %vm522_vm4, 2143289344, %v521_v50 }
  0x64   :  { %v362_v45 = vadd.f32 %v359_v54, %v53_v33  ;;  %v603_v47 = vpop.eup %602  ;;  %v526_v8 = vsel %vm512_vm2, 1065353216, %v525_v60  ;;  %v386_v21 = vsel %vm384_vm7, %v385_v38, %v383_v62  ;;  %v488_v37 = vadd.f32 -1.0, %v910_v48 }
  0x65   :  { %v605_v52 = vpop.eup %604  ;;  %v254_v53 = vxor.u32 2147483648, %v603_v47  ;;  %v331_v33 = vshrl.u32 %v313_v39, %v329_v49  ;;  %v334_v42 = vadd.s32 127, %v333_v13  ;;  %v400_v2 = vmul.f32 0.3, %v526_v8 }
  0x66   :  { %v370_v40 = vadd.f32 %v367_v0, %v362_v45  ;;  %v251_v24 = vxor.u32 2147483648, %v605_v52  ;;  %v607_v58 = vpop.eup %606  ;;  %v412_v43 = vmul.f32 %v488_v37, %v965_v29  ;;  %vm391_vm15 = vcmp.eq.f32.partialorder %v953_v12, 0.0 }
  0x67   :  { %v255_v59 = vsel %vm253_vm13, %v254_v53, %v605_v52  ;;  %v332_v5 = vor.u32 %v331_v33, %v330_v51  ;;  %v335_v6 = vshll.u32 %v334_v42, 23  ;;  %v558_v11 = vmul.f32 0.8, %v607_v58 }
  0x68   :  { %421 = vst [vmem:[#allocation4 + $0x18] sm:$0xff] %v370_v40  ;;  %v252_v0 = vsel %vm250_vm12, %v603_v47, %v251_v24  ;;  %v403_v27 = vadd.f32 %v400_v2, %v394_v41  ;;  %v428_v46 = vadd.f32 %v370_v40, %v746_v17  ;;  %vm537_vm12 = vcmp.eq.f32.partialorder %v910_v48, 1065353216 }
  0x69   :  { %v256_v9 = vsel %vm249_vm14, %v252_v0, %v255_v59  ;;  %v336_v16 = vor.u32 4788187, %v335_v6  ;;  %v339_v20 = vcvt.s32.f32 %v332_v5  ;;  %612 = vpow2.f32 %v558_v11 }
  0x6a   :  { %v257_v15 = vsel %vm246_vm1, nan, %v256_v9  ;;  %v609_v25 = vpop.eup %608  ;;  %vm547_vm13 = vcmp.ne.f32.partialorder %v910_v48, %v910_v48  ;;  %v414_v31 = vadd.f32 %v411_v56, %v403_v27  ;;  %v344_v17 = vsel %vm259_vm8, 0, %v319_v34 }
  0x6b   :  { %v360_v26 = vmul.f32 0.3, %v257_v15  ;;  %v611_v10 = vpop.eup %610  ;;  %v337_v44 = vand.u32 2147483647, %v336_v16  ;;  %v540_v30 = vsel %vm535_vm9, 2143289344, %v609_v25  ;;  %vm389_vm14 = vcmp.eq.f32.partialorder %v953_v12, inf }
  0x6c   :  { %v541_v35 = vsel %vm536_vm10, 0, %v540_v30  ;;  %v395_v41 = vmul.f32 0.4, %v386_v21  ;;  %425 = vst [vmem:[#allocation4 + $0x30] sm:$0xff] %v414_v31  ;;  %v388_v54 = vmul.f32 %v611_v10, %v953_v12  ;;  %v431_v61 = vadd.f32 %v428_v46, %v414_v31 }
  0x6d   :  { %v363_v7 = vadd.f32 %v360_v26, %v941_v3  ;;  %v340_v39 = vmul.f32 %v339_v20, %v337_v44  ;;  %v546_v63 = vsel %vm539_vm11, 2139095040, %v541_v35  ;;  %v348_v45 = vadd.s32 3, %v344_v17 }
  0x6e   :  { %v550_v3 = vsel %vm547_vm13, 2143289344, %v546_v63  ;;  %v392_v23 = vand.u32 2147483648, %v953_v12  ;;  %v390_v36 = vsel %vm389_vm14, %v953_v12, %v388_v54  ;;  %vm560_vm0 = vcmp.lt.f32.partialorder %v953_v12, 0 }
  0x6f   :  { %v371_v4 = vadd.f32 %v958_v22, %v363_v7  ;;  %v343_v1 = vsel %vm259_vm8, %v761_v32, %v340_v39  ;;  %v551_v14 = vsel %vm537_vm12, 1065353216, %v550_v3  ;;  %v434_v22 = vmul.f32 0.33333334, %v431_v61 }
  0x70   :  { %614 = vcosq.f32 %v343_v1  ;;  %v401_v34 = vmul.f32 0.3, %v551_v14  ;;  %vm561_vm1 = vcmp.eq.f32.partialorder %v953_v12, 0  ;;  %vm564_vm2 = vcmp.eq.f32.partialorder %v953_v12, 2139095040 }
  0x71   :  { %422 = vst [vmem:[#allocation4 + $0x20] sm:$0xff] %v371_v4  ;;  %616 = vsinq.f32 %v343_v1  ;;  %437 = vst [vmem:[#allocation6] sm:$0xff] %v434_v22  ;;  %v429_v48 = vadd.f32 %v371_v4, %v748_v18  ;;  %v349_v40 = vand.u32 3, %v348_v45  ;;  %v393_v49 = vsel %vm391_vm15, %v392_v23, %v390_v36 }
  0x72   :  { %v404_v28 = vadd.f32 %v401_v34, %v395_v41  ;;  %vm572_vm3 = vcmp.ne.f32.partialorder %v953_v12, %v953_v12  ;;  %vm562_vm4 = vcmp.eq.f32.partialorder %v953_v12, 1065353216  ;;  %v489_v52 = vadd.f32 -1.0, %v953_v12 }
  0x73   :  { %v613_v38 = vpop.eup %612  ;;  %v396_v55 = vmul.f32 0.4, %v393_v49  ;;  %vm354_vm5 = vcmp.eq.s32.totalorder %v349_v40, 2  ;;  %v52_v60 = vmul.f32 %v761_v32, %v761_v32  ;;  %vm351_vm6 = vcmp.eq.s32.totalorder %v349_v40, 0 }
  0x74   :  { %v415_v47 = vadd.f32 %v412_v43, %v404_v28  ;;  %v565_v51 = vsel %vm560_vm0, 2143289344, %v613_v38  ;;  %v413_v58 = vmul.f32 %v489_v52, %v965_v29  ;;  %vm350_vm7 = vcmp.lt.s32.totalorder %v349_v40, 2 }
  0x75   :  { %v566_v13 = vsel %vm561_vm1, 0, %v565_v51  ;;  %vm347_vm8 = vweird.f32 %v761_v32  ;;  %v55_v9 = vmul.f32 0.4, %v52_v60  ;;  %v369_v15 = vmul.f32 %v925_v57, %v761_v32 }
  0x76   :  { %426 = vst [vmem:[#allocation4 + $0x38] sm:$0xff] %v415_v47  ;;  %v432_v53 = vadd.f32 %v429_v48, %v415_v47  ;;  %v571_v18 = vsel %vm564_vm2, 2139095040, %v566_v13 }
  0x77   :  { %v575_v56 = vsel %vm572_vm3, 2143289344, %v571_v18 }
  0x78   :  { %v435_v24 = vmul.f32 0.33333334, %v432_v53  ;;  %v576_v33 = vsel %vm562_vm4, 1065353216, %v575_v56 }
  0x79   :  { %v402_v50 = vmul.f32 0.3, %v576_v33 }
  0x7a   :  { %v615_v42 = vpop.eup %614  ;;  %438 = vst [vmem:[#allocation6 + $0x8] sm:$0xff] %v435_v24 }
  0x7b   :  { %v617_v59 = vpop.eup %616  ;;  %v355_v62 = vxor.u32 2147483648, %v615_v42  ;;  %v405_v0 = vadd.f32 %v402_v50, %v396_v55 }
  0x7c   :  { %v352_v12 = vxor.u32 2147483648, %v617_v59 }
  0x7d   :  { %v356_v5 = vsel %vm354_vm5, %v355_v62, %v617_v59  ;;  %v416_v8 = vadd.f32 %v413_v58, %v405_v0 }
  0x7e   :  { %v353_v6 = vsel %vm351_vm6, %v615_v42, %v352_v12 }
  0x7f   :  { %v357_v2 = vsel %vm350_vm7, %v353_v6, %v356_v5  ;;  %427 = vst [vmem:[#allocation4 + $0x40] sm:$0xff] %v416_v8 }
  0x80   :  { %v358_v11 = vsel %vm347_vm8, nan, %v357_v2 }
  0x81   :  { %v361_v29 = vmul.f32 0.3, %v358_v11 }
  0x83   :  { %v364_v16 = vadd.f32 %v361_v29, %v55_v9 }
  0x85   :  { %v372_v20 = vadd.f32 %v369_v15, %v364_v16 }
  0x87   :  { %423 = vst [vmem:[#allocation4 + $0x28] sm:$0xff] %v372_v20  ;;  %v430_v21 = vadd.f32 %v372_v20, %v750_v19 }
  0x88   :  { %641 = shalt.err (!%p638_p9)
}
  0x89   :  { %s642_s23 = scalar_lea.hbm %s1089_s4, 1152 }
  0x8a   :  { %p643_p10 = scmp.ne.s32.totalorder %s1089_s4, %s642_s23  ;;  %p646_p11 = scmp.lt.u32.totalorder %s642_s23, %s1089_s4 }
  0x8c   :  { %p648_p12 = pnand %p646_p11, %p643_p10 }
  0x8e   :  { %651 = shalt.err (!%p648_p12)
}
  0x8f   :  { %s689_s27 = smov 128   ;;  %s690_s28 = smov 8   ;;  %v433_v19 = vadd.f32 %v430_v21, %v416_v8 }
  0x90   :  { %451 = dma.vmem_to_hbm [thread:$0]  %s446_s17, 1152, %s1089_s4, [#allocation5], %s689_s27, %s689_s27, %s690_s28  }
  0x91   :  { %v436_v32 = vmul.f32 0.33333334, %v433_v19  ;;  %s652_s6 = scalar_lea.vmem %s458_s19, 384  ;;  %p657_p0 = scmp.lt.s32.totalorder %s458_s19, %s458_s19 }
  0x92   :  { %p653_p13 = scmp.ne.s32.totalorder %s458_s19, %s652_s6  ;;  %p658_p1 = scmp.lt.s32.totalorder %s652_s6, %s652_s6 }
  0x93   :  { %439 = vst [vmem:[#allocation6 + $0x10] sm:$0xff] %v436_v32 }
  0x94   :  { %p659_p2 = por %p658_p1, %p657_p0 }
  0x96   :  { %p660_p3 = pnand %p659_p2, %p653_p13 }
  0x98   :  { %663 = shalt.err (!%p660_p3)
}
  0x99   :  { %s664_s1 = scalar_lea.hbm %s1090_s5, 384 }
  0x9a   :  { %p665_p4 = scmp.ne.s32.totalorder %s1090_s5, %s664_s1  ;;  %p668_p5 = scmp.lt.u32.totalorder %s664_s1, %s1090_s5 }
  0x9c   :  { %p670_p6 = pnand %p668_p5, %p665_p4 }
  0x9e   :  { %673 = shalt.err (!%p670_p6)
}
  0x9f   :  { %463 = dma.vmem_to_hbm [thread:$0]  %s458_s19, 384, %s1090_s5, [#allocation7], %s689_s27, %s689_s27, %s690_s28  }
  0xa0   :  { %676 = dma.done.wait [#allocation5], 1152  }
  0xa1   :  { %677 = vsyncadd [#allocation5], 4294966144 }
  0xa2   :  { %678 = dma.done.wait [#allocation7], 384  }
  0xa3   :  { %679 = vsyncadd [#allocation7], 4294966912 }
  0xa4   :  { %470 = vsyncpa [#allocation5], 1 }
  0xa5   :  { %471 = vsyncpa [#allocation7], 1 }

</bundles_post_ra>
